<compile_context>
chip_gen: v7x
topology: tpu7x:2x2x1
jax: 0.10.0
libtpu: 0.0.40
codegen_flags: <defaults>
</compile_context>

<pallas_src>
import functools

import jax
import jax.numpy as jnp
from jax import lax
from jax.experimental import pallas as pl
from jax.experimental.pallas import tpu as pltpu


def down4_kernel(x_ref, w_ref, b_ref, or_ref, oi_ref, *, cout, kche, th, wo):
    """One (image, band of `th` output rows) per grid step.

    x_ref : (th, 2*kche, Wc) bf16 — per output row, stride-2 row/col phases of the
            padded input; channels [:kche] = even input columns, [kche:] = odd,
            each ordered (kh, [xr(Cin); xi(Cin)]).
    w_ref : (3, 2*cout, kche) bf16 — complex-packed taps grouped by kw.
    b_ref : (2*cout, 1) f32 — packed bias [br - bi ; br + bi].
    or_ref / oi_ref : (th, cout, wo) f32 — real / imag outputs.
    """
    w0 = w_ref[0]          # kw = 0 taps (even columns)
    w1 = w_ref[1]          # kw = 1 taps (odd columns)
    w2 = w_ref[2]          # kw = 2 taps (even columns, shifted by one)
    b = b_ref[...]         # (2*cout, 1)
    for r in range(th):
        xrow = x_ref[r]                        # (2*kche, Wc) bf16
        xe = xrow[:kche, :]
        xo = xrow[kche:, :]
        acc = jnp.dot(w0, xe[:, :wo], preferred_element_type=jnp.float32)
        acc += jnp.dot(w1, xo[:, :wo], preferred_element_type=jnp.float32)
        acc += jnp.dot(w2, xe[:, 1:wo + 1], preferred_element_type=jnp.float32)
        z = jnp.maximum(acc + b, 0.0)          # bias + complex_relu
        or_ref[r] = z[:cout, :].astype(or_ref.dtype)
        oi_ref[r] = z[cout:, :].astype(oi_ref.dtype)


def _pick_band_rows(ho, n, target=16):
    """Largest divisor of Ho <= target keeping >= 4 total grid steps if possible."""
    divs = [d for d in range(1, min(ho, target) + 1) if ho % d == 0]
    good = [d for d in divs if n * (ho // d) >= 4]
    return max(good) if good else max(divs)


@jax.jit
def down4_forward(x, wr, wi, br, bi):
    """x: complex64 (N, Cin, H, W); wr/wi: (Cout, Cin, 3, 3); br/bi: (Cout,)."""
    N, Cin, H, W = x.shape
    Cout = wr.shape[0]
    Ho = (H + 2 - 3) // 2 + 1
    Wo = (W + 2 - 3) // 2 + 1
    Wc = Wo + 1                      # even/odd column planes carry one halo column
    cin2 = 2 * Cin                   # [xr ; xi] channel packing
    kche = 3 * cin2                  # (kh, complex-packed channel) contraction size

    # ---- input layout: bf16 early, pad once, split stride-2 row/col phases -------
    xc = jnp.concatenate([jnp.real(x), jnp.imag(x)], axis=1).astype(jnp.bfloat16)
    pad_b = 2 * Ho - H               # rows 2*r + kh reach 2*Ho in the padded frame
    pad_r = 2 * Wo + 1 - W           # cols 2*wo + kw reach 2*Wo (+1 keeps width even)
    xp = jnp.pad(xc, ((0, 0), (0, 0), (1, pad_b), (1, pad_r)))
    Hp = H + 1 + pad_b
    xp = xp.reshape(N, cin2, Hp, Wc, 2)            # [..., 0] = even col, 1 = odd col
    rows3 = jnp.stack([xp[:, :, kh:kh + 2 * Ho:2] for kh in range(3)], axis=1)
    #   (N, 3[kh], 2Cin, Ho, Wc, 2[par]) -> (N, Ho, 2[par], 3[kh], 2Cin, Wc)
    planes = rows3.transpose(0, 3, 5, 1, 2, 4).reshape(N, Ho, 2 * kche, Wc)

    # ---- complex-packed weights / bias -------------------------------------------
    w_top = jnp.concatenate([wr, -wi], axis=1)     # real out:  Wr*xr - Wi*xi
    w_bot = jnp.concatenate([wi, wr], axis=1)      # imag out:  Wi*xr + Wr*xi
    wpk = jnp.concatenate([w_top, w_bot], axis=0)  # (2Cout, 2Cin, 3, 3)
    wq = wpk.transpose(3, 0, 2, 1).reshape(3, 2 * Cout, kche).astype(jnp.bfloat16)
    bp = jnp.concatenate([br - bi, br + bi]).astype(jnp.float32).reshape(2 * Cout, 1)

    th = _pick_band_rows(Ho, N)
    grid = (N, Ho // th)

    # ---- VMEM budget with per-generation cap (v7x: 64 MiB per TensorCore) --------
    est = (2 * th * 2 * kche * Wc * 2          # input band block x2 buffers (bf16)
           + 2 * 3 * 2 * Cout * kche * 2       # packed weights x2 buffers (bf16)
           + 2 * 2 * Cout * 4                  # packed bias
           + 2 * 2 * th * Cout * Wo * 4)       # two f32 output blocks x2 buffers
    try:
        cap = int(pltpu.get_tpu_info().vmem_capacity_bytes)
    except Exception:
        cap = 128 << 20
    gen_cap = (36 << 20) if cap <= (64 << 20) else (48 << 20)
    vmem_limit = int(min(max(4 * est, 16 << 20), gen_cap))

    kernel = functools.partial(down4_kernel, cout=Cout, kche=kche, th=th, wo=Wo)
    out_r, out_i = pl.pallas_call(
        kernel,
        out_shape=(jax.ShapeDtypeStruct((N, Ho, Cout, Wo), jnp.float32),
                   jax.ShapeDtypeStruct((N, Ho, Cout, Wo), jnp.float32)),
        grid_spec=pltpu.PrefetchScalarGridSpec(
            num_scalar_prefetch=0,
            grid=grid,
            in_specs=[
                # Row-plane band: one image, th output rows, full channel/width extent.
                pl.BlockSpec((None, th, 2 * kche, Wc), lambda n, b: (n, b, 0, 0)),
                # Constant index maps -> fetched once by the pipeline (few KiB each).
                pl.BlockSpec((3, 2 * Cout, kche), lambda n, b: (0, 0, 0)),
                pl.BlockSpec((2 * Cout, 1), lambda n, b: (0, 0)),
            ],
            out_specs=[
                pl.BlockSpec((None, th, Cout, Wo), lambda n, b: (n, b, 0, 0)),
                pl.BlockSpec((None, th, Cout, Wo), lambda n, b: (n, b, 0, 0)),
            ],
        ),
        compiler_params=pltpu.CompilerParams(
            dimension_semantics=("parallel", "parallel"),
            vmem_limit_bytes=vmem_limit),
    )(planes, wq, bp)

    # (N, Ho, Cout, Wo) -> NCHW; XLA fuses this transpose into the complex interleave.
    out_r = out_r.transpose(0, 2, 1, 3)
    out_i = out_i.transpose(0, 2, 1, 3)
    return lax.complex(out_r, out_i)               # NCHW complex64


def down4_reference(x, wr, wi, br, bi):
    """Pure-JAX reference (lax conv) mirroring apply_complex + complex_relu."""
    xr = jnp.real(x).astype(jnp.float32)
    xi = jnp.imag(x).astype(jnp.float32)
    dn = ("NCHW", "OIHW", "NCHW")

    def conv(inp, w):
        return lax.conv_general_dilated(inp, w, window_strides=(2, 2),
                                        padding=((1, 1), (1, 1)),
                                        dimension_numbers=dn)

    def b(v):
        return v.reshape(1, -1, 1, 1)

    real = (conv(xr, wr) + b(br)) - (conv(xi, wi) + b(bi))
    imag = (conv(xi, wr) + b(br)) + (conv(xr, wi) + b(bi))
    return lax.complex(jnp.maximum(real, 0.0), jnp.maximum(imag, 0.0))


if __name__ == "__main__":
    # Small shapes consistent with Down4: batch=2, Cin=4, Cout=8, 16x16 spatial.
    N, Cin, Cout, H, W = 2, 4, 8, 16, 16
    key = jax.random.PRNGKey(0)
    k_xr, k_xi, k_wr, k_wi, k_br, k_bi = jax.random.split(key, 6)

    xr = jax.random.normal(k_xr, (N, Cin, H, W), dtype=jnp.float32)
    xi = jax.random.normal(k_xi, (N, Cin, H, W), dtype=jnp.float32)
    x = lax.complex(xr, xi)  # complex64 NCHW, like x = torch.from_numpy(x)

    wr = 0.1 * jax.random.normal(k_wr, (Cout, Cin, 3, 3), dtype=jnp.float32)
    wi = 0.1 * jax.random.normal(k_wi, (Cout, Cin, 3, 3), dtype=jnp.float32)
    br = 0.1 * jax.random.normal(k_br, (Cout,), dtype=jnp.float32)
    bi = 0.1 * jax.random.normal(k_bi, (Cout,), dtype=jnp.float32)

    out = jax.block_until_ready(down4_forward(x, wr, wi, br, bi))
    ref = jax.block_until_ready(down4_reference(x, wr, wi, br, bi))

    assert out.shape == (N, Cout, H // 2, W // 2) and out.dtype == jnp.complex64
    # bf16 MXU operands (f32 accumulation) -> looser tolerance than pure f32.
    assert jnp.allclose(jnp.real(out), jnp.real(ref), atol=5e-2, rtol=5e-2)
    assert jnp.allclose(jnp.imag(out), jnp.imag(ref), atol=5e-2, rtol=5e-2)

    print("KERNEL_OK")
</pallas_src>

<mosaic_0001>
module attributes {stable_mosaic.version = 11 : i64} {
  func.func @down4_kernel(%arg0: i32, %arg1: i32, %arg2: memref<1x4x48x9xbf16, #tpu.memory_space<vmem>>, %arg3: memref<3x16x24xbf16, #tpu.memory_space<vmem>>, %arg4: memref<16x1xf32, #tpu.memory_space<vmem>>, %arg5: memref<1x4x8x8xf32, #tpu.memory_space<vmem>>, %arg6: memref<1x4x8x8xf32, #tpu.memory_space<vmem>>) attributes {dimension_semantics = [#tpu.dimension_semantics<parallel>, #tpu.dimension_semantics<parallel>], iteration_bounds = array<i64: 2, 2>, scalar_prefetch = 0 : i64, scratch_operands = 0 : i64, tpu.core_type = #tpu.core_type<tc>, window_params = [{transform_indices = @transform_0, window_bounds = array<i64: 1, 4, 48, 9>}, {pipeline_mode = #tpu.pipeline_mode<synchronous>, transform_indices = @transform_1, window_bounds = array<i64: 3, 16, 24>}, {pipeline_mode = #tpu.pipeline_mode<synchronous>, transform_indices = @transform_2, window_bounds = array<i64: 16, 1>}, {transform_indices = @transform_3, window_bounds = array<i64: 1, 4, 8, 8>}, {transform_indices = @transform_4, window_bounds = array<i64: 1, 4, 8, 8>}]} {
    %c0 = arith.constant 0 : index
    %c0_0 = arith.constant 0 : index
    %c0_1 = arith.constant 0 : index
    %0 = vector.load %arg3[%c0, %c0_0, %c0_1] : memref<3x16x24xbf16, #tpu.memory_space<vmem>>, vector<1x16x24xbf16>
    %1 = vector.shape_cast %0 : vector<1x16x24xbf16> to vector<16x24xbf16>
    %c1 = arith.constant 1 : index
    %c0_2 = arith.constant 0 : index
    %c0_3 = arith.constant 0 : index
    %2 = vector.load %arg3[%c1, %c0_2, %c0_3] : memref<3x16x24xbf16, #tpu.memory_space<vmem>>, vector<1x16x24xbf16>
    %3 = vector.shape_cast %2 : vector<1x16x24xbf16> to vector<16x24xbf16>
    %c2 = arith.constant 2 : index
    %c0_4 = arith.constant 0 : index
    %c0_5 = arith.constant 0 : index
    %4 = vector.load %arg3[%c2, %c0_4, %c0_5] : memref<3x16x24xbf16, #tpu.memory_space<vmem>>, vector<1x16x24xbf16>
    %5 = vector.shape_cast %4 : vector<1x16x24xbf16> to vector<16x24xbf16>
    %c0_6 = arith.constant 0 : index
    %c0_7 = arith.constant 0 : index
    %6 = vector.load %arg4[%c0_6, %c0_7] : memref<16x1xf32, #tpu.memory_space<vmem>>, vector<16x1xf32>
    %c0_8 = arith.constant 0 : index
    %c0_9 = arith.constant 0 : index
    %c0_10 = arith.constant 0 : index
    %c0_11 = arith.constant 0 : index
    %7 = vector.load %arg2[%c0_8, %c0_9, %c0_10, %c0_11] : memref<1x4x48x9xbf16, #tpu.memory_space<vmem>>, vector<1x1x48x9xbf16>
    %8 = vector.shape_cast %7 : vector<1x1x48x9xbf16> to vector<48x9xbf16>
    %9 = vector.extract_strided_slice %8 {offsets = [0, 0], sizes = [24, 9], strides = [1, 1]} : vector<48x9xbf16> to vector<24x9xbf16>
    %10 = vector.extract_strided_slice %8 {offsets = [24, 0], sizes = [24, 9], strides = [1, 1]} : vector<48x9xbf16> to vector<24x9xbf16>
    %11 = vector.extract_strided_slice %9 {offsets = [0, 0], sizes = [24, 8], strides = [1, 1]} : vector<24x9xbf16> to vector<24x8xbf16>
    %cst = arith.constant dense<0.000000e+00> : vector<16x8xf32>
    %12 = tpu.matmul %1, %11, %cst {dimension_numbers = #tpu.dot_dimension_numbers<[1], [0], [0], [1], [0, 0, 1, 1], [], []>} : vector<16x24xbf16>, vector<24x8xbf16>, vector<16x8xf32> -> vector<16x8xf32>
    %13 = vector.extract_strided_slice %10 {offsets = [0, 0], sizes = [24, 8], strides = [1, 1]} : vector<24x9xbf16> to vector<24x8xbf16>
    %cst_12 = arith.constant dense<0.000000e+00> : vector<16x8xf32>
    %14 = tpu.matmul %3, %13, %cst_12 {dimension_numbers = #tpu.dot_dimension_numbers<[1], [0], [0], [1], [0, 0, 1, 1], [], []>} : vector<16x24xbf16>, vector<24x8xbf16>, vector<16x8xf32> -> vector<16x8xf32>
    %15 = arith.addf %12, %14 : vector<16x8xf32>
    %16 = vector.extract_strided_slice %9 {offsets = [0, 1], sizes = [24, 8], strides = [1, 1]} : vector<24x9xbf16> to vector<24x8xbf16>
    %cst_13 = arith.constant dense<0.000000e+00> : vector<16x8xf32>
    %17 = tpu.matmul %5, %16, %cst_13 {dimension_numbers = #tpu.dot_dimension_numbers<[1], [0], [0], [1], [0, 0, 1, 1], [], []>} : vector<16x24xbf16>, vector<24x8xbf16>, vector<16x8xf32> -> vector<16x8xf32>
    %18 = arith.addf %15, %17 : vector<16x8xf32>
    %19 = vector.broadcast %6 : vector<16x1xf32> to vector<16x8xf32>
    %20 = arith.addf %18, %19 : vector<16x8xf32>
    %cst_14 = arith.constant 0.000000e+00 : f32
    %21 = vector.broadcast %cst_14 : f32 to vector<16x8xf32>
    %22 = arith.maximumf %20, %21 : vector<16x8xf32>
    %23 = vector.extract_strided_slice %22 {offsets = [0, 0], sizes = [8, 8], strides = [1, 1]} : vector<16x8xf32> to vector<8x8xf32>
    %c0_15 = arith.constant 0 : index
    %c0_16 = arith.constant 0 : index
    %c0_17 = arith.constant 0 : index
    %c0_18 = arith.constant 0 : index
    %24 = vector.load %arg5[%c0_15, %c0_16, %c0_17, %c0_18] : memref<1x4x8x8xf32, #tpu.memory_space<vmem>>, vector<1x1x8x8xf32>
    %25 = vector.shape_cast %24 : vector<1x1x8x8xf32> to vector<8x8xf32>
    %26 = vector.shape_cast %23 : vector<8x8xf32> to vector<1x1x8x8xf32>
    tpu.vector_store %arg5[%c0_15, %c0_16, %c0_17, %c0_18], %26 {strides = array<i32>} : memref<1x4x8x8xf32, #tpu.memory_space<vmem>>, vector<1x1x8x8xf32>,
    %27 = vector.extract_strided_slice %22 {offsets = [8, 0], sizes = [8, 8], strides = [1, 1]} : vector<16x8xf32> to vector<8x8xf32>
    %c0_19 = arith.constant 0 : index
    %c0_20 = arith.constant 0 : index
    %c0_21 = arith.constant 0 : index
    %c0_22 = arith.constant 0 : index
    %28 = vector.load %arg6[%c0_19, %c0_20, %c0_21, %c0_22] : memref<1x4x8x8xf32, #tpu.memory_space<vmem>>, vector<1x1x8x8xf32>
    %29 = vector.shape_cast %28 : vector<1x1x8x8xf32> to vector<8x8xf32>
    %30 = vector.shape_cast %27 : vector<8x8xf32> to vector<1x1x8x8xf32>
    tpu.vector_store %arg6[%c0_19, %c0_20, %c0_21, %c0_22], %30 {strides = array<i32>} : memref<1x4x8x8xf32, #tpu.memory_space<vmem>>, vector<1x1x8x8xf32>,
    %c0_23 = arith.constant 0 : index
    %c1_24 = arith.constant 1 : index
    %c0_25 = arith.constant 0 : index
    %c0_26 = arith.constant 0 : index
    %31 = vector.load %arg2[%c0_23, %c1_24, %c0_25, %c0_26] : memref<1x4x48x9xbf16, #tpu.memory_space<vmem>>, vector<1x1x48x9xbf16>
    %32 = vector.shape_cast %31 : vector<1x1x48x9xbf16> to vector<48x9xbf16>
    %33 = vector.extract_strided_slice %32 {offsets = [0, 0], sizes = [24, 9], strides = [1, 1]} : vector<48x9xbf16> to vector<24x9xbf16>
    %34 = vector.extract_strided_slice %32 {offsets = [24, 0], sizes = [24, 9], strides = [1, 1]} : vector<48x9xbf16> to vector<24x9xbf16>
    %35 = vector.extract_strided_slice %33 {offsets = [0, 0], sizes = [24, 8], strides = [1, 1]} : vector<24x9xbf16> to vector<24x8xbf16>
    %cst_27 = arith.constant dense<0.000000e+00> : vector<16x8xf32>
    %36 = tpu.matmul %1, %35, %cst_27 {dimension_numbers = #tpu.dot_dimension_numbers<[1], [0], [0], [1], [0, 0, 1, 1], [], []>} : vector<16x24xbf16>, vector<24x8xbf16>, vector<16x8xf32> -> vector<16x8xf32>
    %37 = vector.extract_strided_slice %34 {offsets = [0, 0], sizes = [24, 8], strides = [1, 1]} : vector<24x9xbf16> to vector<24x8xbf16>
    %cst_28 = arith.constant dense<0.000000e+00> : vector<16x8xf32>
    %38 = tpu.matmul %3, %37, %cst_28 {dimension_numbers = #tpu.dot_dimension_numbers<[1], [0], [0], [1], [0, 0, 1, 1], [], []>} : vector<16x24xbf16>, vector<24x8xbf16>, vector<16x8xf32> -> vector<16x8xf32>
    %39 = arith.addf %36, %38 : vector<16x8xf32>
    %40 = vector.extract_strided_slice %33 {offsets = [0, 1], sizes = [24, 8], strides = [1, 1]} : vector<24x9xbf16> to vector<24x8xbf16>
    %cst_29 = arith.constant dense<0.000000e+00> : vector<16x8xf32>
    %41 = tpu.matmul %5, %40, %cst_29 {dimension_numbers = #tpu.dot_dimension_numbers<[1], [0], [0], [1], [0, 0, 1, 1], [], []>} : vector<16x24xbf16>, vector<24x8xbf16>, vector<16x8xf32> -> vector<16x8xf32>
    %42 = arith.addf %39, %41 : vector<16x8xf32>
    %43 = vector.broadcast %6 : vector<16x1xf32> to vector<16x8xf32>
    %44 = arith.addf %42, %43 : vector<16x8xf32>
    %cst_30 = arith.constant 0.000000e+00 : f32
    %45 = vector.broadcast %cst_30 : f32 to vector<16x8xf32>
    %46 = arith.maximumf %44, %45 : vector<16x8xf32>
    %47 = vector.extract_strided_slice %46 {offsets = [0, 0], sizes = [8, 8], strides = [1, 1]} : vector<16x8xf32> to vector<8x8xf32>
    %c0_31 = arith.constant 0 : index
    %c1_32 = arith.constant 1 : index
    %c0_33 = arith.constant 0 : index
    %c0_34 = arith.constant 0 : index
    %48 = vector.load %arg5[%c0_31, %c1_32, %c0_33, %c0_34] : memref<1x4x8x8xf32, #tpu.memory_space<vmem>>, vector<1x1x8x8xf32>
    %49 = vector.shape_cast %48 : vector<1x1x8x8xf32> to vector<8x8xf32>
    %50 = vector.shape_cast %47 : vector<8x8xf32> to vector<1x1x8x8xf32>
    tpu.vector_store %arg5[%c0_31, %c1_32, %c0_33, %c0_34], %50 {strides = array<i32>} : memref<1x4x8x8xf32, #tpu.memory_space<vmem>>, vector<1x1x8x8xf32>,
    %51 = vector.extract_strided_slice %46 {offsets = [8, 0], sizes = [8, 8], strides = [1, 1]} : vector<16x8xf32> to vector<8x8xf32>
    %c0_35 = arith.constant 0 : index
    %c1_36 = arith.constant 1 : index
    %c0_37 = arith.constant 0 : index
    %c0_38 = arith.constant 0 : index
    %52 = vector.load %arg6[%c0_35, %c1_36, %c0_37, %c0_38] : memref<1x4x8x8xf32, #tpu.memory_space<vmem>>, vector<1x1x8x8xf32>
    %53 = vector.shape_cast %52 : vector<1x1x8x8xf32> to vector<8x8xf32>
    %54 = vector.shape_cast %51 : vector<8x8xf32> to vector<1x1x8x8xf32>
    tpu.vector_store %arg6[%c0_35, %c1_36, %c0_37, %c0_38], %54 {strides = array<i32>} : memref<1x4x8x8xf32, #tpu.memory_space<vmem>>, vector<1x1x8x8xf32>,
    %c0_39 = arith.constant 0 : index
    %c2_40 = arith.constant 2 : index
    %c0_41 = arith.constant 0 : index
    %c0_42 = arith.constant 0 : index
    %55 = vector.load %arg2[%c0_39, %c2_40, %c0_41, %c0_42] : memref<1x4x48x9xbf16, #tpu.memory_space<vmem>>, vector<1x1x48x9xbf16>
    %56 = vector.shape_cast %55 : vector<1x1x48x9xbf16> to vector<48x9xbf16>
    %57 = vector.extract_strided_slice %56 {offsets = [0, 0], sizes = [24, 9], strides = [1, 1]} : vector<48x9xbf16> to vector<24x9xbf16>
    %58 = vector.extract_strided_slice %56 {offsets = [24, 0], sizes = [24, 9], strides = [1, 1]} : vector<48x9xbf16> to vector<24x9xbf16>
    %59 = vector.extract_strided_slice %57 {offsets = [0, 0], sizes = [24, 8], strides = [1, 1]} : vector<24x9xbf16> to vector<24x8xbf16>
    %cst_43 = arith.constant dense<0.000000e+00> : vector<16x8xf32>
    %60 = tpu.matmul %1, %59, %cst_43 {dimension_numbers = #tpu.dot_dimension_numbers<[1], [0], [0], [1], [0, 0, 1, 1], [], []>} : vector<16x24xbf16>, vector<24x8xbf16>, vector<16x8xf32> -> vector<16x8xf32>
    %61 = vector.extract_strided_slice %58 {offsets = [0, 0], sizes = [24, 8], strides = [1, 1]} : vector<24x9xbf16> to vector<24x8xbf16>
    %cst_44 = arith.constant dense<0.000000e+00> : vector<16x8xf32>
    %62 = tpu.matmul %3, %61, %cst_44 {dimension_numbers = #tpu.dot_dimension_numbers<[1], [0], [0], [1], [0, 0, 1, 1], [], []>} : vector<16x24xbf16>, vector<24x8xbf16>, vector<16x8xf32> -> vector<16x8xf32>
    %63 = arith.addf %60, %62 : vector<16x8xf32>
    %64 = vector.extract_strided_slice %57 {offsets = [0, 1], sizes = [24, 8], strides = [1, 1]} : vector<24x9xbf16> to vector<24x8xbf16>
    %cst_45 = arith.constant dense<0.000000e+00> : vector<16x8xf32>
    %65 = tpu.matmul %5, %64, %cst_45 {dimension_numbers = #tpu.dot_dimension_numbers<[1], [0], [0], [1], [0, 0, 1, 1], [], []>} : vector<16x24xbf16>, vector<24x8xbf16>, vector<16x8xf32> -> vector<16x8xf32>
    %66 = arith.addf %63, %65 : vector<16x8xf32>
    %67 = vector.broadcast %6 : vector<16x1xf32> to vector<16x8xf32>
    %68 = arith.addf %66, %67 : vector<16x8xf32>
    %cst_46 = arith.constant 0.000000e+00 : f32
    %69 = vector.broadcast %cst_46 : f32 to vector<16x8xf32>
    %70 = arith.maximumf %68, %69 : vector<16x8xf32>
    %71 = vector.extract_strided_slice %70 {offsets = [0, 0], sizes = [8, 8], strides = [1, 1]} : vector<16x8xf32> to vector<8x8xf32>
    %c0_47 = arith.constant 0 : index
    %c2_48 = arith.constant 2 : index
    %c0_49 = arith.constant 0 : index
    %c0_50 = arith.constant 0 : index
    %72 = vector.load %arg5[%c0_47, %c2_48, %c0_49, %c0_50] : memref<1x4x8x8xf32, #tpu.memory_space<vmem>>, vector<1x1x8x8xf32>
    %73 = vector.shape_cast %72 : vector<1x1x8x8xf32> to vector<8x8xf32>
    %74 = vector.shape_cast %71 : vector<8x8xf32> to vector<1x1x8x8xf32>
    tpu.vector_store %arg5[%c0_47, %c2_48, %c0_49, %c0_50], %74 {strides = array<i32>} : memref<1x4x8x8xf32, #tpu.memory_space<vmem>>, vector<1x1x8x8xf32>,
    %75 = vector.extract_strided_slice %70 {offsets = [8, 0], sizes = [8, 8], strides = [1, 1]} : vector<16x8xf32> to vector<8x8xf32>
    %c0_51 = arith.constant 0 : index
    %c2_52 = arith.constant 2 : index
    %c0_53 = arith.constant 0 : index
    %c0_54 = arith.constant 0 : index
    %76 = vector.load %arg6[%c0_51, %c2_52, %c0_53, %c0_54] : memref<1x4x8x8xf32, #tpu.memory_space<vmem>>, vector<1x1x8x8xf32>
    %77 = vector.shape_cast %76 : vector<1x1x8x8xf32> to vector<8x8xf32>
    %78 = vector.shape_cast %75 : vector<8x8xf32> to vector<1x1x8x8xf32>
    tpu.vector_store %arg6[%c0_51, %c2_52, %c0_53, %c0_54], %78 {strides = array<i32>} : memref<1x4x8x8xf32, #tpu.memory_space<vmem>>, vector<1x1x8x8xf32>,
    %c0_55 = arith.constant 0 : index
    %c3 = arith.constant 3 : index
    %c0_56 = arith.constant 0 : index
    %c0_57 = arith.constant 0 : index
    %79 = vector.load %arg2[%c0_55, %c3, %c0_56, %c0_57] : memref<1x4x48x9xbf16, #tpu.memory_space<vmem>>, vector<1x1x48x9xbf16>
    %80 = vector.shape_cast %79 : vector<1x1x48x9xbf16> to vector<48x9xbf16>
    %81 = vector.extract_strided_slice %80 {offsets = [0, 0], sizes = [24, 9], strides = [1, 1]} : vector<48x9xbf16> to vector<24x9xbf16>
    %82 = vector.extract_strided_slice %80 {offsets = [24, 0], sizes = [24, 9], strides = [1, 1]} : vector<48x9xbf16> to vector<24x9xbf16>
    %83 = vector.extract_strided_slice %81 {offsets = [0, 0], sizes = [24, 8], strides = [1, 1]} : vector<24x9xbf16> to vector<24x8xbf16>
    %cst_58 = arith.constant dense<0.000000e+00> : vector<16x8xf32>
    %84 = tpu.matmul %1, %83, %cst_58 {dimension_numbers = #tpu.dot_dimension_numbers<[1], [0], [0], [1], [0, 0, 1, 1], [], []>} : vector<16x24xbf16>, vector<24x8xbf16>, vector<16x8xf32> -> vector<16x8xf32>
    %85 = vector.extract_strided_slice %82 {offsets = [0, 0], sizes = [24, 8], strides = [1, 1]} : vector<24x9xbf16> to vector<24x8xbf16>
    %cst_59 = arith.constant dense<0.000000e+00> : vector<16x8xf32>
    %86 = tpu.matmul %3, %85, %cst_59 {dimension_numbers = #tpu.dot_dimension_numbers<[1], [0], [0], [1], [0, 0, 1, 1], [], []>} : vector<16x24xbf16>, vector<24x8xbf16>, vector<16x8xf32> -> vector<16x8xf32>
    %87 = arith.addf %84, %86 : vector<16x8xf32>
    %88 = vector.extract_strided_slice %81 {offsets = [0, 1], sizes = [24, 8], strides = [1, 1]} : vector<24x9xbf16> to vector<24x8xbf16>
    %cst_60 = arith.constant dense<0.000000e+00> : vector<16x8xf32>
    %89 = tpu.matmul %5, %88, %cst_60 {dimension_numbers = #tpu.dot_dimension_numbers<[1], [0], [0], [1], [0, 0, 1, 1], [], []>} : vector<16x24xbf16>, vector<24x8xbf16>, vector<16x8xf32> -> vector<16x8xf32>
    %90 = arith.addf %87, %89 : vector<16x8xf32>
    %91 = vector.broadcast %6 : vector<16x1xf32> to vector<16x8xf32>
    %92 = arith.addf %90, %91 : vector<16x8xf32>
    %cst_61 = arith.constant 0.000000e+00 : f32
    %93 = vector.broadcast %cst_61 : f32 to vector<16x8xf32>
    %94 = arith.maximumf %92, %93 : vector<16x8xf32>
    %95 = vector.extract_strided_slice %94 {offsets = [0, 0], sizes = [8, 8], strides = [1, 1]} : vector<16x8xf32> to vector<8x8xf32>
    %c0_62 = arith.constant 0 : index
    %c3_63 = arith.constant 3 : index
    %c0_64 = arith.constant 0 : index
    %c0_65 = arith.constant 0 : index
    %96 = vector.load %arg5[%c0_62, %c3_63, %c0_64, %c0_65] : memref<1x4x8x8xf32, #tpu.memory_space<vmem>>, vector<1x1x8x8xf32>
    %97 = vector.shape_cast %96 : vector<1x1x8x8xf32> to vector<8x8xf32>
    %98 = vector.shape_cast %95 : vector<8x8xf32> to vector<1x1x8x8xf32>
    tpu.vector_store %arg5[%c0_62, %c3_63, %c0_64, %c0_65], %98 {strides = array<i32>} : memref<1x4x8x8xf32, #tpu.memory_space<vmem>>, vector<1x1x8x8xf32>,
    %99 = vector.extract_strided_slice %94 {offsets = [8, 0], sizes = [8, 8], strides = [1, 1]} : vector<16x8xf32> to vector<8x8xf32>
    %c0_66 = arith.constant 0 : index
    %c3_67 = arith.constant 3 : index
    %c0_68 = arith.constant 0 : index
    %c0_69 = arith.constant 0 : index
    %100 = vector.load %arg6[%c0_66, %c3_67, %c0_68, %c0_69] : memref<1x4x8x8xf32, #tpu.memory_space<vmem>>, vector<1x1x8x8xf32>
    %101 = vector.shape_cast %100 : vector<1x1x8x8xf32> to vector<8x8xf32>
    %102 = vector.shape_cast %99 : vector<8x8xf32> to vector<1x1x8x8xf32>
    tpu.vector_store %arg6[%c0_66, %c3_67, %c0_68, %c0_69], %102 {strides = array<i32>} : memref<1x4x8x8xf32, #tpu.memory_space<vmem>>, vector<1x1x8x8xf32>,
    return
  }
  func.func @transform_0(%arg0: i32, %arg1: i32) -> (i32, i32, i32, i32) {
    %c0_i32 = arith.constant 0 : i32
    %c0_i32_0 = arith.constant 0 : i32
    %c0_i32_1 = arith.constant 0 : i32
    return %arg0, %arg1, %c0_i32, %c0_i32_0 : i32, i32, i32, i32
  }
  func.func @transform_1(%arg0: i32, %arg1: i32) -> (i32, i32, i32) {
    %c0_i32 = arith.constant 0 : i32
    %c0_i32_0 = arith.constant 0 : i32
    %c0_i32_1 = arith.constant 0 : i32
    %c0_i32_2 = arith.constant 0 : i32
    return %c0_i32, %c0_i32_0, %c0_i32_1 : i32, i32, i32
  }
  func.func @transform_2(%arg0: i32, %arg1: i32) -> (i32, i32) {
    %c0_i32 = arith.constant 0 : i32
    %c0_i32_0 = arith.constant 0 : i32
    %c0_i32_1 = arith.constant 0 : i32
    return %c0_i32, %c0_i32_0 : i32, i32
  }
  func.func @transform_3(%arg0: i32, %arg1: i32) -> (i32, i32, i32, i32) {
    %c0_i32 = arith.constant 0 : i32
    %c0_i32_0 = arith.constant 0 : i32
    %c0_i32_1 = arith.constant 0 : i32
    return %arg0, %arg1, %c0_i32, %c0_i32_0 : i32, i32, i32, i32
  }
  func.func @transform_4(%arg0: i32, %arg1: i32) -> (i32, i32, i32, i32) {
    %c0_i32 = arith.constant 0 : i32
    %c0_i32_0 = arith.constant 0 : i32
    %c0_i32_1 = arith.constant 0 : i32
    return %arg0, %arg1, %c0_i32, %c0_i32_0 : i32, i32, i32, i32
  }
}

</mosaic_0001>

<bundles_post_ra>
// kernel: custom-call.1
= control target key start
LH: loop header
LB: loop body
LE: loop exit
PB: predicated region body
PF: predicated region fallthrough
CT: control target
= control target key end

     0   :  { %s217_s0 = inlined_call_operand.vmem [shape: c64[2,4,16,16], index: 0, kind: input, shape index: {}]   ;;  %s218_s1 = inlined_call_operand.vmem [shape: f32[2,4,16,16], index: 1, kind: output, shape index: {}]  }
   0x1   :  { %v80_v0 = vld [vmem:[%s217_s0 + $0x80] sm:$0xff]  ;;  %v81_v1 = vld [vmem:[%s217_s0 + $0x88] sm:$0xff]  ;;  %v83_v2 = vld [vmem:[%s217_s0 + $0x90] sm:$0xff] }
   0x2   :  { %4 = vst [vmem:[%s218_s1] sm:$0xff] %v80_v0  ;;  %82 = vst [vmem:[%s218_s1 + $0x8] sm:$0xff] %v81_v1  ;;  %v85_v3 = vld [vmem:[%s217_s0 + $0x98] sm:$0xff]  ;;  %v87_v4 = vld [vmem:[%s217_s0 + $0xa0] sm:$0xff] }
   0x3   :  { %84 = vst [vmem:[%s218_s1 + $0x10] sm:$0xff] %v83_v2  ;;  %v89_v5 = vld [vmem:[%s217_s0 + $0xa8] sm:$0xff]  ;;  %86 = vst [vmem:[%s218_s1 + $0x18] sm:$0xff] %v85_v3  ;;  %v91_v6 = vld [vmem:[%s217_s0 + $0xb0] sm:$0xff] }
   0x4   :  { %88 = vst [vmem:[%s218_s1 + $0x20] sm:$0xff] %v87_v4  ;;  %90 = vst [vmem:[%s218_s1 + $0x28] sm:$0xff] %v89_v5  ;;  %v93_v7 = vld [vmem:[%s217_s0 + $0xb8] sm:$0xff]  ;;  %v95_v8 = vld [vmem:[%s217_s0 + $0xc0] sm:$0xff] }
   0x5   :  { %92 = vst [vmem:[%s218_s1 + $0x30] sm:$0xff] %v91_v6  ;;  %94 = vst [vmem:[%s218_s1 + $0x38] sm:$0xff] %v93_v7  ;;  %v97_v9 = vld [vmem:[%s217_s0 + $0xc8] sm:$0xff]  ;;  %v99_v10 = vld [vmem:[%s217_s0 + $0xd0] sm:$0xff] }
   0x6   :  { %96 = vst [vmem:[%s218_s1 + $0x40] sm:$0xff] %v95_v8  ;;  %v101_v11 = vld [vmem:[%s217_s0 + $0xd8] sm:$0xff]  ;;  %98 = vst [vmem:[%s218_s1 + $0x48] sm:$0xff] %v97_v9  ;;  %v103_v12 = vld [vmem:[%s217_s0 + $0xe0] sm:$0xff] }
   0x7   :  { %100 = vst [vmem:[%s218_s1 + $0x50] sm:$0xff] %v99_v10  ;;  %102 = vst [vmem:[%s218_s1 + $0x58] sm:$0xff] %v101_v11  ;;  %v105_v13 = vld [vmem:[%s217_s0 + $0xe8] sm:$0xff]  ;;  %v107_v14 = vld [vmem:[%s217_s0 + $0xf0] sm:$0xff] }
   0x8   :  { %104 = vst [vmem:[%s218_s1 + $0x60] sm:$0xff] %v103_v12  ;;  %106 = vst [vmem:[%s218_s1 + $0x68] sm:$0xff] %v105_v13  ;;  %v109_v15 = vld [vmem:[%s217_s0 + $0xf8] sm:$0xff] }
   0x9   :  { %108 = vst [vmem:[%s218_s1 + $0x70] sm:$0xff] %v107_v14  ;;  %110 = vst [vmem:[%s218_s1 + $0x78] sm:$0xff] %v109_v15 }

// kernel: custom-call
= control target key start
LH: loop header
LB: loop body
LE: loop exit
PB: predicated region body
PF: predicated region fallthrough
CT: control target
= control target key end

     0   :  { %s200_s0 = inlined_call_operand.vmem [shape: c64[2,4,16,16], index: 0, kind: input, shape index: {}]   ;;  %s201_s1 = inlined_call_operand.vmem [shape: f32[2,4,16,16], index: 1, kind: output, shape index: {}]  }
   0x1   :  { %v2_v0 = vld [vmem:[%s200_s0] sm:$0xff]  ;;  %v64_v1 = vld [vmem:[%s200_s0 + $0x8] sm:$0xff]  ;;  %v66_v2 = vld [vmem:[%s200_s0 + $0x10] sm:$0xff] }
   0x2   :  { %3 = vst [vmem:[%s201_s1] sm:$0xff] %v2_v0  ;;  %65 = vst [vmem:[%s201_s1 + $0x8] sm:$0xff] %v64_v1  ;;  %v68_v3 = vld [vmem:[%s200_s0 + $0x18] sm:$0xff]  ;;  %v70_v4 = vld [vmem:[%s200_s0 + $0x20] sm:$0xff] }
   0x3   :  { %67 = vst [vmem:[%s201_s1 + $0x10] sm:$0xff] %v66_v2  ;;  %v72_v5 = vld [vmem:[%s200_s0 + $0x28] sm:$0xff]  ;;  %69 = vst [vmem:[%s201_s1 + $0x18] sm:$0xff] %v68_v3  ;;  %v74_v6 = vld [vmem:[%s200_s0 + $0x30] sm:$0xff] }
   0x4   :  { %71 = vst [vmem:[%s201_s1 + $0x20] sm:$0xff] %v70_v4  ;;  %73 = vst [vmem:[%s201_s1 + $0x28] sm:$0xff] %v72_v5  ;;  %v76_v7 = vld [vmem:[%s200_s0 + $0x38] sm:$0xff]  ;;  %v78_v8 = vld [vmem:[%s200_s0 + $0x40] sm:$0xff] }
   0x5   :  { %75 = vst [vmem:[%s201_s1 + $0x30] sm:$0xff] %v74_v6  ;;  %77 = vst [vmem:[%s201_s1 + $0x38] sm:$0xff] %v76_v7  ;;  %v80_v9 = vld [vmem:[%s200_s0 + $0x48] sm:$0xff]  ;;  %v82_v10 = vld [vmem:[%s200_s0 + $0x50] sm:$0xff] }
   0x6   :  { %79 = vst [vmem:[%s201_s1 + $0x40] sm:$0xff] %v78_v8  ;;  %v84_v11 = vld [vmem:[%s200_s0 + $0x58] sm:$0xff]  ;;  %81 = vst [vmem:[%s201_s1 + $0x48] sm:$0xff] %v80_v9  ;;  %v86_v12 = vld [vmem:[%s200_s0 + $0x60] sm:$0xff] }
   0x7   :  { %83 = vst [vmem:[%s201_s1 + $0x50] sm:$0xff] %v82_v10  ;;  %85 = vst [vmem:[%s201_s1 + $0x58] sm:$0xff] %v84_v11  ;;  %v88_v13 = vld [vmem:[%s200_s0 + $0x68] sm:$0xff]  ;;  %v90_v14 = vld [vmem:[%s200_s0 + $0x70] sm:$0xff] }
   0x8   :  { %87 = vst [vmem:[%s201_s1 + $0x60] sm:$0xff] %v86_v12  ;;  %89 = vst [vmem:[%s201_s1 + $0x68] sm:$0xff] %v88_v13  ;;  %v92_v15 = vld [vmem:[%s200_s0 + $0x78] sm:$0xff] }
   0x9   :  { %91 = vst [vmem:[%s201_s1 + $0x70] sm:$0xff] %v90_v14  ;;  %93 = vst [vmem:[%s201_s1 + $0x78] sm:$0xff] %v92_v15 }

// kernel: custom-call.2
= control target key start
LH: loop header
LB: loop body
LE: loop exit
PB: predicated region body
PF: predicated region fallthrough
CT: control target
= control target key end

     0   :  { %s412_s0 = inlined_call_operand.vmem [shape: f32[2,8,8,8], index: 0, kind: input, shape index: {}]   ;;  %s413_s2 = inlined_call_operand.vmem [shape: c64[2,8,8,8], index: 2, kind: output, shape index: {}]   ;;  %s414_s1 = inlined_call_operand.vmem [shape: f32[2,8,8,8], index: 1, kind: input, shape index: {}]  }
   0x1   :  { %v5_v0 = vld [vmem:[%s412_s0] sm:$0xff]  ;;  %v144_v1 = vld [vmem:[%s412_s0 + $0x8] sm:$0xff]  ;;  %v146_v2 = vld [vmem:[%s412_s0 + $0x10] sm:$0xff] }
   0x2   :  { %6 = vst [vmem:[%s413_s2] sm:$0xff] %v5_v0  ;;  %145 = vst [vmem:[%s413_s2 + $0x8] sm:$0xff] %v144_v1  ;;  %v148_v3 = vld [vmem:[%s412_s0 + $0x18] sm:$0xff]  ;;  %v150_v4 = vld [vmem:[%s412_s0 + $0x20] sm:$0xff] }
   0x3   :  { %147 = vst [vmem:[%s413_s2 + $0x10] sm:$0xff] %v146_v2  ;;  %v152_v5 = vld [vmem:[%s412_s0 + $0x28] sm:$0xff]  ;;  %149 = vst [vmem:[%s413_s2 + $0x18] sm:$0xff] %v148_v3  ;;  %v154_v6 = vld [vmem:[%s412_s0 + $0x30] sm:$0xff] }
   0x4   :  { %151 = vst [vmem:[%s413_s2 + $0x20] sm:$0xff] %v150_v4  ;;  %153 = vst [vmem:[%s413_s2 + $0x28] sm:$0xff] %v152_v5  ;;  %v156_v7 = vld [vmem:[%s412_s0 + $0x38] sm:$0xff]  ;;  %v158_v8 = vld [vmem:[%s412_s0 + $0x40] sm:$0xff] }
   0x5   :  { %155 = vst [vmem:[%s413_s2 + $0x30] sm:$0xff] %v154_v6  ;;  %157 = vst [vmem:[%s413_s2 + $0x38] sm:$0xff] %v156_v7  ;;  %v160_v9 = vld [vmem:[%s412_s0 + $0x48] sm:$0xff]  ;;  %v162_v10 = vld [vmem:[%s412_s0 + $0x50] sm:$0xff] }
   0x6   :  { %159 = vst [vmem:[%s413_s2 + $0x40] sm:$0xff] %v158_v8  ;;  %v164_v11 = vld [vmem:[%s412_s0 + $0x58] sm:$0xff]  ;;  %161 = vst [vmem:[%s413_s2 + $0x48] sm:$0xff] %v160_v9  ;;  %v166_v12 = vld [vmem:[%s412_s0 + $0x60] sm:$0xff] }
   0x7   :  { %163 = vst [vmem:[%s413_s2 + $0x50] sm:$0xff] %v162_v10  ;;  %165 = vst [vmem:[%s413_s2 + $0x58] sm:$0xff] %v164_v11  ;;  %v168_v13 = vld [vmem:[%s412_s0 + $0x68] sm:$0xff]  ;;  %v170_v14 = vld [vmem:[%s412_s0 + $0x70] sm:$0xff] }
   0x8   :  { %167 = vst [vmem:[%s413_s2 + $0x60] sm:$0xff] %v166_v12  ;;  %169 = vst [vmem:[%s413_s2 + $0x68] sm:$0xff] %v168_v13  ;;  %v172_v15 = vld [vmem:[%s412_s0 + $0x78] sm:$0xff]  ;;  %v67_v16 = vld [vmem:[%s414_s1] sm:$0xff] }
   0x9   :  { %171 = vst [vmem:[%s413_s2 + $0x70] sm:$0xff] %v170_v14  ;;  %v175_v17 = vld [vmem:[%s414_s1 + $0x8] sm:$0xff]  ;;  %173 = vst [vmem:[%s413_s2 + $0x78] sm:$0xff] %v172_v15  ;;  %v177_v18 = vld [vmem:[%s414_s1 + $0x10] sm:$0xff] }
   0xa   :  { %174 = vst [vmem:[%s413_s2 + $0x80] sm:$0xff] %v67_v16  ;;  %176 = vst [vmem:[%s413_s2 + $0x88] sm:$0xff] %v175_v17  ;;  %v179_v19 = vld [vmem:[%s414_s1 + $0x18] sm:$0xff]  ;;  %v181_v20 = vld [vmem:[%s414_s1 + $0x20] sm:$0xff] }
   0xb   :  { %178 = vst [vmem:[%s413_s2 + $0x90] sm:$0xff] %v177_v18  ;;  %180 = vst [vmem:[%s413_s2 + $0x98] sm:$0xff] %v179_v19  ;;  %v183_v21 = vld [vmem:[%s414_s1 + $0x28] sm:$0xff]  ;;  %v185_v22 = vld [vmem:[%s414_s1 + $0x30] sm:$0xff] }
   0xc   :  { %182 = vst [vmem:[%s413_s2 + $0xa0] sm:$0xff] %v181_v20  ;;  %v187_v23 = vld [vmem:[%s414_s1 + $0x38] sm:$0xff]  ;;  %184 = vst [vmem:[%s413_s2 + $0xa8] sm:$0xff] %v183_v21  ;;  %v189_v24 = vld [vmem:[%s414_s1 + $0x40] sm:$0xff] }
   0xd   :  { %186 = vst [vmem:[%s413_s2 + $0xb0] sm:$0xff] %v185_v22  ;;  %188 = vst [vmem:[%s413_s2 + $0xb8] sm:$0xff] %v187_v23  ;;  %v191_v25 = vld [vmem:[%s414_s1 + $0x48] sm:$0xff]  ;;  %v193_v26 = vld [vmem:[%s414_s1 + $0x50] sm:$0xff] }
   0xe   :  { %190 = vst [vmem:[%s413_s2 + $0xc0] sm:$0xff] %v189_v24  ;;  %192 = vst [vmem:[%s413_s2 + $0xc8] sm:$0xff] %v191_v25  ;;  %v195_v27 = vld [vmem:[%s414_s1 + $0x58] sm:$0xff]  ;;  %v197_v28 = vld [vmem:[%s414_s1 + $0x60] sm:$0xff] }
   0xf   :  { %194 = vst [vmem:[%s413_s2 + $0xd0] sm:$0xff] %v193_v26  ;;  %v199_v29 = vld [vmem:[%s414_s1 + $0x68] sm:$0xff]  ;;  %196 = vst [vmem:[%s413_s2 + $0xd8] sm:$0xff] %v195_v27  ;;  %v201_v30 = vld [vmem:[%s414_s1 + $0x70] sm:$0xff] }
  0x10   :  { %198 = vst [vmem:[%s413_s2 + $0xe0] sm:$0xff] %v197_v28  ;;  %200 = vst [vmem:[%s413_s2 + $0xe8] sm:$0xff] %v199_v29  ;;  %v203_v31 = vld [vmem:[%s414_s1 + $0x78] sm:$0xff] }
  0x11   :  { %202 = vst [vmem:[%s413_s2 + $0xf0] sm:$0xff] %v201_v30  ;;  %204 = vst [vmem:[%s413_s2 + $0xf8] sm:$0xff] %v203_v31 }

// kernel: down4_forward.1
= control target key start
LH: loop header
LB: loop body
LE: loop exit
PB: predicated region body
PF: predicated region fallthrough
CT: control target
= control target key end

     0   :  { %s1482_s15 = smov 0   ;;  %s1484_s16 = smov 0   ;;  %s1717_s0 = inlined_call_operand.vmem [shape: bf16[2,8,48,9], index: 0, kind: input, shape index: {}]   ;;  %s1718_s1 = inlined_call_operand.vmem [shape: bf16[3,16,24], index: 1, kind: input, shape index: {}]   ;;  %s1719_s2 = inlined_call_operand.vmem [shape: f32[16,1], index: 2, kind: input, shape index: {}]   ;;  %s1720_s3 = inlined_call_operand.vmem [shape: f32[2,8,8,8], index: 3, kind: output, shape index: {0}]   ;;  %s1721_s4 = inlined_call_operand.vmem [shape: f32[2,8,8,8], index: 4, kind: output, shape index: {1}]  }
   0x1   :  { %s1486_s17 = smov 0   ;;  %s1488_s18 = smov 0  }
   0x2   :  { %s1490_s19 = smov 0  }
   0x3 LB: > { %s24_s20 = sadd.s32 1, %s1443_s17  ;;  %s27_s21 = sadd.s32 1, %s1447_s18  ;;  %s1451_s19 = sphi %s1490_s19, %s15_s19   ;;  %s1447_s18 = sphi %s1488_s18, %s1725_s18   ;;  %s1443_s17 = sphi %s1486_s17, %s1724_s17   ;;  %s1439_s16 = sphi %s1484_s16, %s1723_s16   ;;  %s1435_s15 = sphi %s1482_s15, %s1722_s15  }
   0x4   : > { %p25_p0 = scmp.ge.s32.totalorder %s24_s20, 2  ;;  %p1144_p1 = scmp.ge.s32.totalorder %s1451_s19, 1 }
   0x5   : > { %p189_p2 = scmp.lt.s32.totalorder %s1451_s19, 5 }
   0x6   : > { %s1727_s20 = smov (%p25_p0, %s24_s20), 0  ;;  %s1729_s21 = smov (!%p25_p0, %s27_s21), %s1447_s18 }
   0x7   : > { %p190_p3 = pnand %p1144_p1, %p189_p2  ;;  %p29_p4 = scmp.ge.s32.totalorder %s1729_s21, 2 }
   0x8   : > { %s1145_s22 = sshll.u32 (!%p190_p3), %s1435_s15, 2  ;;  %p234_p5 = scmp.lt.s32.totalorder (!%p190_p3), %s1439_s16, 1  ;;  %v1453_v0 = vmov (!%p190_p3), 0.0   ;;  %vm1454_vm0 = vmmov (!%p190_p3), 0   ;;  %vm299_vm1 = vcmask (!%p190_p3), 1043456   ;;  %v1545_v6 = vld [vmem:[%s1718_s1] sm:$0xff] (!%p190_p3)  }
   0x9   : > { %s1731_s21 = smov (%p29_p4, %s1729_s21), 0  ;;  %193 = sbr.rel (%p190_p3) target bundleno = 402 (0x192), region = 32 }
   0xa   : > { %p236_p6 = scmp.lt.s32.totalorder (!%p190_p3), %s1145_s22, 7  ;;  %1250 = vmatprep.subr.bf16.mxu0 (!%p190_p3), %v1453_v0  ;;  %1258 = vmatprep.subr.bf16.mxu1 (!%p190_p3), %v1453_v0  ;;  %s1455_s30 = smov (!%p190_p3), 127   ;;  %vm295_vm2 = vcmask (!%p190_p3), 195584   ;;  %v1571_v16 = vld [vmem:[%s1718_s1 + $0x8] sm:$0xff] (!%p190_p3)   ;;  %v273_v18 = vld [vmem:[%s1719_s2] sm:$0xff] (!%p190_p3)  ;;  %v1456_v20 = vmov (!%p190_p3), 0  }
   0xb   : > { %1254 = vmatprep.mubr.msk.bf16.mxu0 (!%p190_p3), %vm1454_vm0, %v1453_v0  ;;  %1262 = vmatprep.mubr.msk.bf16.mxu1 (!%p190_p3), %vm1454_vm0, %v1453_v0  ;;  %v274_v19 = vld [vmem:[%s1719_s2 + $0x8] sm:$0xff] (!%p190_p3)  ;;  %v1408_v25 = vld [vmem:[%s1718_s1 + $0x10] sm:$0xff] (!%p190_p3)   ;;  %vm478_vm3 = vcmask (!%p190_p3), 64512  }
   0xc   : > { %1392 = vset.pattern.permute.xlu0 (!%p190_p3), %v1456_v20  ;;  %1393 = vset.pattern.permute.xlu1 (!%p190_p3), %v1456_v20 }
  0x10   : > { %s1733_s16 = smov (!%p234_p5, %s1439_s16), 1  ;;  %s1735_s22 = smov (!%p236_p6, %s1145_s22), 7 }
  0x11   : > { %s1347_s23 = smul.u32 48, %s1733_s16  ;;  %s1148_s15 = sshll.u32 %s1733_s16, 3 }
  0x12   : > { %s1346_s24 = smul.u32 6, %s1735_s22 }
  0x14   : > { %s240_s25 = sadd.s32 %s1347_s23, %s1346_s24  ;;  %s250_s23 = sadd.s32 %s1148_s15, %s1735_s22 }
  0x15   : > { %s1146_s26 = sshll.u32 %s240_s25, 2  ;;  %s1149_s24 = sshll.u32 %s250_s23, 3 }
  0x16   : > { %s1527_s29 = scalar_lea.vmem %s1717_s0, %s1146_s26  ;;  %s1672_s16 = scalar_lea.vmem %s1720_s3, %s1149_s24 }
  0x17   : > { %v1394_v1 = vld [vmem:[%s1527_s29] sm:$0xff]   ;;  %v1395_v2 = vld [vmem:[%s1527_s29 + $0x8] ss:$0 sps:$4 sm:$0xff]   ;;  %v1533_v3 = vld [vmem:[%s1527_s29 + $0x18] sm:$0xff]   ;;  %s1678_s28 = scalar_lea.vmem %s1721_s4, %s1149_s24 }
  0x18   : > { %410 = vrot.lane.b32.xlu0 %v1394_v1, %s1455_s30  ;;  %1259 = vmatpush3.bf16.msra.mxu1 %v1394_v1  ;;  %v1539_v4 = vld [vmem:[%s1527_s29 + $0x20] ss:$0 sps:$4 sm:$0xff]   ;;  %v362_v5 = vsel %vm299_vm1, %v1395_v2, 0  ;;  %v1398_v7 = vld [vmem:[%s1527_s29 + $0x30] sm:$0xff]   ;;  %v1399_v8 = vld [vmem:[%s1527_s29 + $0x38] ss:$0 sps:$4 sm:$0xff]  }
  0x19   : > { %1260 = vmatprep.subr.bf16.mxu1 %v1453_v0  ;;  %594 = vrot.lane.b32.xlu1 %v1533_v3, %s1455_s30  ;;  %v1402_v9 = vld [vmem:[%s1527_s29 + $0xc] sm:$0xff]   ;;  %v1403_v10 = vld [vmem:[%s1527_s29 + $0x14] ss:$0 sps:$4 sm:$0xff]   ;;  %v1406_v11 = vld [vmem:[%s1527_s29 + $0x24] sm:$0xff]   ;;  %v551_v28 = vsel %vm299_vm1, %v1539_v4, 0  ;;  %v723_v29 = vsel %vm299_vm1, %v1399_v8, 0 }
  0x1a   : > { %1251 = vmatpush3.bf16.msra.mxu0 %v1402_v9  ;;  %v1407_v12 = vld [vmem:[%s1527_s29 + $0x2c] ss:$0 sps:$4 sm:$0xff]   ;;  %v301_v14 = vsel %vm299_vm1, %v1403_v10, 0  ;;  %v1566_v15 = vld [vmem:[%s1527_s29 + $0x50] ss:$0 sps:$4 sm:$0xff]   ;;  %v1409_v30 = vld [vmem:[%s1527_s29 + $0x3c] sm:$0xff]  }
  0x1b   : > { %v1561_v13 = vld [vmem:[%s1527_s29 + $0x48] sm:$0xff]   ;;  %1252 = vmatprep.subr.bf16.mxu0 %v1453_v0  ;;  %v498_v17 = vsel %vm299_vm1, %v1407_v12, 0  ;;  %v1410_v31 = vld [vmem:[%s1527_s29 + $0x44] ss:$0 sps:$4 sm:$0xff]   ;;  %v1411_v32 = vld [vmem:[%s1527_s29 + $0x54] sm:$0xff]   ;;  %v895_v42 = vsel %vm299_vm1, %v1566_v15, 0 }
  0x1c   : > { %412 = vrot.lane.b32.xlu0 %v1395_v2, %s1455_s30  ;;  %1261 = vmatpush3.bf16.msra.mxu1 %v362_v5  ;;  %v1412_v33 = vld [vmem:[%s1527_s29 + $0x5c] ss:$0 sps:$4 sm:$0xff]   ;;  %v670_v34 = vsel %vm299_vm1, %v1410_v31, 0 }
  0x1d   : > { %1274 = vmatprep.subr.bf16.mxu1 %v1453_v0  ;;  %596 = vrot.lane.b32.xlu1 %v1539_v4, %s1455_s30  ;;  %v842_v36 = vsel %vm299_vm1, %v1412_v33, 0 }
  0x1e   : > { %1253 = vmatpush3.bf16.msra.mxu0 %v301_v14 }
  0x1f   : > { %1263 = vmatmul.mubr.msk.bf16.vlgmr.msra.gmra.mrb[0].mxu1 %vm295_vm2, %v1545_v6  ;;  %1266 = vmatprep.subr.bf16.mxu0 %v1453_v0 }
  0x20   : > { %766 = vrot.lane.b32.xlu0 %v1398_v7, %s1455_s30  ;;  %1275 = vmatpush3.bf16.msra.mxu1 %v1406_v11 }
  0x21   : > { %1278 = vmatprep.mubr.msk.bf16.mxu1 %vm1454_vm0, %v1453_v0  ;;  %768 = vrot.lane.b32.xlu1 %v1399_v8, %s1455_s30 }
  0x22   : > { %1276 = vmatprep.subr.bf16.mxu1 %v1453_v0  ;;  %1255 = vmatmul.mubr.msk.bf16.vlgmr.msra.gmra.mrb[0].mxu0 %vm295_vm2, %v1571_v16 }
  0x23   : > { %1270 = vmatprep.mubr.msk.bf16.mxu0 %vm1454_vm0, %v1453_v0 }
  0x24   : > { %938 = vrot.lane.b32.xlu0 %v1561_v13, %s1455_s30  ;;  %1277 = vmatpush3.bf16.msra.mxu1 %v498_v17 }
  0x25   : > { %940 = vrot.lane.b32.xlu1 %v1566_v15, %s1455_s30  ;;  %1290 = vmatprep.subr.bf16.mxu1 %v1453_v0 }
  0x27   : > { %1279 = vmatmul.mubr.msk.bf16.vlgmr.msra.gmra.mrb[4].mxu1 %vm295_vm2, %v1571_v16 }
  0x28   : > { %1294 = vmatprep.mubr.msk.bf16.mxu1 %vm1454_vm0, %v1453_v0  ;;  %466 = vperm.xlu0 %1392, %v273_v18  }
  0x29   : > { %471 = vperm.xlu1 %1393, %v274_v19  }
  0x8a   : > { %v411_v21 = vpop.permute.xlu0 %410 }
  0x8b   : > { %1267 = vmatpush3.bf16.msra.mxu0 %v411_v21  ;;  %v595_v22 = vpop.permute.xlu1 %594 }
  0x8c   : > { %1268 = vmatprep.subr.bf16.mxu0 %v1453_v0  ;;  %1291 = vmatpush3.bf16.msra.mxu1 %v595_v22 }
  0x8d   : > { %1292 = vmatprep.subr.bf16.mxu1 %v1453_v0 }
  0x8e   : > { %v413_v23 = vpop.permute.xlu0 %412 }
  0x8f   : > { %v419_v24 = vsel %vm299_vm1, %v413_v23, 0  ;;  %v597_v26 = vpop.permute.xlu1 %596 }
  0x90   : > { %1269 = vmatpush3.bf16.msra.mxu0 %v419_v24  ;;  %v600_v27 = vsel %vm299_vm1, %v597_v26, 0 }
  0x91   : > { %1282 = vmatprep.subr.bf16.mxu0 %v1453_v0  ;;  %1293 = vmatpush3.bf16.msra.mxu1 %v600_v27 }
  0x92   : > { %1306 = vmatprep.subr.bf16.mxu1 %v1453_v0  ;;  %v767_v35 = vpop.permute.xlu0 %766 }
  0x93   : > { %1271 = vmatmul.mubr.msk.bf16.vlgmr.msra.gmra.mrb[4].mxu0 %vm295_vm2, %v1408_v25  ;;  %v769_v37 = vpop.permute.xlu1 %768 }
  0x94   : > { %1283 = vmatpush3.bf16.msra.mxu0 %v1533_v3  ;;  %1286 = vmatprep.mubr.msk.bf16.mxu0 %vm1454_vm0, %v1453_v0  ;;  %v772_v40 = vsel %vm299_vm1, %v769_v37, 0 }
  0x95   : > { %1284 = vmatprep.subr.bf16.mxu0 %v1453_v0  ;;  %1295 = vmatmul.mubr.msk.bf16.vlgmr.msra.gmra.mrb[8].mxu1 %vm295_vm2, %v1408_v25 }
  0x96   : > { %1307 = vmatpush3.bf16.msra.mxu1 %v1398_v7  ;;  %1310 = vmatprep.mubr.msk.bf16.mxu1 %vm1454_vm0, %v1453_v0  ;;  %v939_v38 = vpop.permute.xlu0 %938 }
  0x97   : > { %1308 = vmatprep.subr.bf16.mxu1 %v1453_v0  ;;  %v941_v39 = vpop.permute.xlu1 %940 }
  0x98   : > { %1285 = vmatpush3.bf16.msra.mxu0 %v551_v28  ;;  %v944_v41 = vsel %vm299_vm1, %v941_v39, 0 }
  0x99   : > { %1298 = vmatprep.subr.bf16.mxu0 %v1453_v0 }
  0x9a   : > { %1309 = vmatpush3.bf16.msra.mxu1 %v723_v29 }
  0x9b   : > { %1287 = vmatmul.mubr.msk.bf16.vlgmr.msra.gmra.mrb[8].mxu0 %vm295_vm2, %v1545_v6  ;;  %1322 = vmatprep.subr.bf16.mxu1 %v1453_v0 }
  0x9c   : > { %1299 = vmatpush3.bf16.msra.mxu0 %v1409_v30  ;;  %1302 = vmatprep.mubr.msk.bf16.mxu0 %vm1454_vm0, %v1453_v0 }
  0x9d   : > { %1300 = vmatprep.subr.bf16.mxu0 %v1453_v0  ;;  %1311 = vmatmul.mubr.msk.bf16.vlgmr.msra.gmra.mrb[12].mxu1 %vm295_vm2, %v1545_v6 }
  0x9e   : > { %1323 = vmatpush3.bf16.msra.mxu1 %v1411_v32  ;;  %1326 = vmatprep.mubr.msk.bf16.mxu1 %vm1454_vm0, %v1453_v0 }
  0x9f   : > { %1324 = vmatprep.subr.bf16.mxu1 %v1453_v0 }
  0xa0   : > { %1301 = vmatpush3.bf16.msra.mxu0 %v670_v34 }
  0xa1   : > { %1314 = vmatprep.subr.bf16.mxu0 %v1453_v0 }
  0xa2   : > { %1325 = vmatpush3.bf16.msra.mxu1 %v842_v36 }
  0xa3   : > { %1303 = vmatmul.mubr.msk.bf16.vlgmr.msra.gmra.mrb[12].mxu0 %vm295_vm2, %v1571_v16  ;;  %1338 = vmatprep.subr.bf16.mxu1 %v1453_v0 }
  0xa4   : > { %1315 = vmatpush3.bf16.msra.mxu0 %v767_v35  ;;  %1318 = vmatprep.mubr.msk.bf16.mxu0 %vm1454_vm0, %v1453_v0 }
  0xa5   : > { %1316 = vmatprep.subr.bf16.mxu0 %v1453_v0  ;;  %1327 = vmatmul.mubr.msk.bf16.vlgmr.msra.gmra.mrb[16].mxu1 %vm295_vm2, %v1571_v16 }
  0xa6   : > { %1339 = vmatpush3.bf16.msra.mxu1 %v939_v38  ;;  %1342 = vmatprep.mubr.msk.bf16.mxu1 %vm1454_vm0, %v1453_v0 }
  0xa7   : > { %1340 = vmatprep.subr.bf16.mxu1 %v1453_v0  ;;  %v1664_v58 = vpop.permute.xlu0 %466 }
  0xa8   : > { %1317 = vmatpush3.bf16.msra.mxu0 %v772_v40  ;;  %v1666_v61 = vpop.permute.xlu1 %471 }
  0xa9   : > { %1330 = vmatprep.subr.bf16.mxu0 %v1453_v0 }
  0xaa   : > { %1341 = vmatpush3.bf16.msra.mxu1 %v944_v41 }
  0xab   : > { %1319 = vmatmul.mubr.msk.bf16.vlgmr.msra.gmra.mrb[16].mxu0 %vm295_vm2, %v1408_v25 }
  0xac   : > { %1331 = vmatpush3.bf16.msra.mxu0 %v1561_v13  ;;  %1334 = vmatprep.mubr.msk.bf16.mxu0 %vm1454_vm0, %v1453_v0 }
  0xad   : > { %1332 = vmatprep.subr.bf16.mxu0 %v1453_v0  ;;  %1343 = vmatmul.mubr.msk.bf16.vlgmr.msra.gmra.mrb[20].mxu1 %vm295_vm2, %v1408_v25 }
  0xb0   : > { %1333 = vmatpush3.bf16.msra.mxu0 %v895_v42 }
  0xb3   : > { %1335 = vmatmul.mubr.msk.bf16.vlgmr.msra.gmra.mrb[20].mxu0 %vm295_vm2, %v1545_v6 }
  0xf2   : > { %v398_v43 = vpop.f32.mrb[0].mxu1 }
  0xf3   : > { %v1264_v44 = vpop.f32.mrb[1].mxu1 }
  0xf4   : > { %v401_v45 = vpop.f32.mrb[2].mxu1 }
  0xf5   : > { %v1265_v46 = vpop.f32.mrb[3].mxu1  ;;  %v337_v47 = vpop.f32.mrb[0].mxu0 }
  0xf6   : > { %v1256_v48 = vpop.f32.mrb[1].mxu0  ;;  %v399_v49 = vadd.f32 %v398_v43, %v337_v47 }
  0xf7   : > { %v340_v50 = vpop.f32.mrb[2].mxu0 }
  0xf8   : > { %v1257_v52 = vpop.f32.mrb[3].mxu0  ;;  %v402_v53 = vadd.f32 %v401_v45, %v340_v50 }
  0xfa   : > { %v534_v51 = vpop.f32.mrb[4].mxu1 }
  0xfb   : > { %v1280_v54 = vpop.f32.mrb[5].mxu1 }
  0xfc   : > { %v537_v55 = vpop.f32.mrb[6].mxu1 }
  0xfd   : > { %v1281_v56 = vpop.f32.mrb[7].mxu1 }
 0x166   : > { %v455_v57 = vpop.f32.mrb[4].mxu0 }
 0x167   : > { %v462_v59 = vadd.f32 %v455_v57, %v399_v49  ;;  %v1272_v60 = vpop.f32.mrb[5].mxu0 }
 0x168   : > { %v458_v62 = vpop.f32.mrb[6].mxu0  ;;  %v636_v63 = vpop.f32.mrb[8].mxu1 }
 0x169   : > { %v463_v0 = vadd.f32 %v458_v62, %v402_v53  ;;  %v474_v1 = vadd.f32 %v1664_v58, %v462_v59  ;;  %v1273_v2 = vpop.f32.mrb[7].mxu0  ;;  %v1296_v3 = vpop.f32.mrb[9].mxu1 }
 0x16a   : > { %v639_v4 = vpop.f32.mrb[10].mxu1 }
 0x16b   : > { %v476_v5 = vmax.f32 %v474_v1, 0.0  ;;  %v475_v6 = vadd.f32 %v1666_v61, %v463_v0  ;;  %v1297_v7 = vpop.f32.mrb[11].mxu1 }
 0x16d   : > { %479 = vst.msk [vmem:[%s1672_s16] sm:$0xff] %vm478_vm3, %v476_v5  ;;  %v477_v8 = vmax.f32 %v475_v6, 0.0 }
 0x16e   : > { %v587_v9 = vpop.f32.mrb[8].mxu0 }
 0x16f   : > { %480 = vst.msk [vmem:[%s1678_s28] sm:$0xff] %vm478_vm3, %v477_v8  ;;  %v588_v10 = vadd.f32 %v587_v9, %v534_v51  ;;  %v1288_v11 = vpop.f32.mrb[9].mxu0 }
 0x170   : > { %v590_v12 = vpop.f32.mrb[10].mxu0  ;;  %v759_v13 = vpop.f32.mrb[12].mxu1 }
 0x171   : > { %v643_v14 = vadd.f32 %v636_v63, %v588_v10  ;;  %v591_v15 = vadd.f32 %v590_v12, %v537_v55  ;;  %v1289_v16 = vpop.f32.mrb[11].mxu0  ;;  %v1312_v17 = vpop.f32.mrb[13].mxu1 }
 0x172   : > { %v762_v18 = vpop.f32.mrb[14].mxu1 }
 0x173   : > { %v645_v19 = vadd.f32 %v643_v14, %v1664_v58  ;;  %v644_v20 = vadd.f32 %v639_v4, %v591_v15  ;;  %v1313_v21 = vpop.f32.mrb[15].mxu1 }
 0x175   : > { %v647_v22 = vmax.f32 %v645_v19, 0.0  ;;  %v646_v23 = vadd.f32 %v644_v20, %v1666_v61 }
 0x176   : > { %v706_v24 = vpop.f32.mrb[12].mxu0 }
 0x177   : > { %1180 = vst.msk [vmem:[%s1672_s16 + $0x8] sm:$0xff] %vm478_vm3, %v647_v22  ;;  %v648_v25 = vmax.f32 %v646_v23, 0.0  ;;  %v760_v26 = vadd.f32 %v759_v13, %v706_v24  ;;  %v1304_v27 = vpop.f32.mrb[13].mxu0 }
 0x178   : > { %v709_v28 = vpop.f32.mrb[14].mxu0  ;;  %v878_v29 = vpop.f32.mrb[16].mxu1 }
 0x179   : > { %1181 = vst.msk [vmem:[%s1678_s28 + $0x8] sm:$0xff] %vm478_vm3, %v648_v25  ;;  %v763_v30 = vadd.f32 %v762_v18, %v709_v28  ;;  %v1305_v31 = vpop.f32.mrb[15].mxu0  ;;  %v1328_v32 = vpop.f32.mrb[17].mxu1 }
 0x17a   : > { %v881_v33 = vpop.f32.mrb[18].mxu1 }
 0x17b   : > { %v1329_v34 = vpop.f32.mrb[19].mxu1 }
 0x17e   : > { %v808_v35 = vpop.f32.mrb[16].mxu0 }
 0x17f   : > { %v815_v36 = vadd.f32 %v808_v35, %v760_v26  ;;  %v1320_v37 = vpop.f32.mrb[17].mxu0 }
 0x180   : > { %v811_v38 = vpop.f32.mrb[18].mxu0  ;;  %v980_v39 = vpop.f32.mrb[20].mxu1 }
 0x181   : > { %v817_v40 = vadd.f32 %v815_v36, %v1664_v58  ;;  %v816_v41 = vadd.f32 %v811_v38, %v763_v30  ;;  %v1321_v42 = vpop.f32.mrb[19].mxu0  ;;  %v1344_v43 = vpop.f32.mrb[21].mxu1 }
 0x182   : > { %v983_v44 = vpop.f32.mrb[22].mxu1 }
 0x183   : > { %v819_v45 = vmax.f32 %v817_v40, 0.0  ;;  %v818_v46 = vadd.f32 %v816_v41, %v1666_v61  ;;  %v1345_v47 = vpop.f32.mrb[23].mxu1 }
 0x185   : > { %1195 = vst.msk [vmem:[%s1672_s16 + $0x10] sm:$0xff] %vm478_vm3, %v819_v45  ;;  %v820_v48 = vmax.f32 %v818_v46, 0.0 }
 0x186   : > { %v931_v49 = vpop.f32.mrb[20].mxu0 }
 0x187   : > { %1196 = vst.msk [vmem:[%s1678_s28 + $0x10] sm:$0xff] %vm478_vm3, %v820_v48  ;;  %v932_v50 = vadd.f32 %v931_v49, %v878_v29  ;;  %v1336_v51 = vpop.f32.mrb[21].mxu0 }
 0x188   : > { %v934_v52 = vpop.f32.mrb[22].mxu0 }
 0x189   : > { %v987_v53 = vadd.f32 %v980_v39, %v932_v50  ;;  %v935_v54 = vadd.f32 %v934_v52, %v881_v33  ;;  %v1337_v55 = vpop.f32.mrb[23].mxu0 }
 0x18b   : > { %v989_v56 = vadd.f32 %v987_v53, %v1664_v58  ;;  %v988_v57 = vadd.f32 %v983_v44, %v935_v54 }
 0x18d   : > { %v991_v59 = vmax.f32 %v989_v56, 0.0  ;;  %v990_v60 = vadd.f32 %v988_v57, %v1666_v61 }
 0x18f   : > { %1210 = vst.msk [vmem:[%s1672_s16 + $0x18] sm:$0xff] %vm478_vm3, %v991_v59  ;;  %v992_v62 = vmax.f32 %v990_v60, 0.0 }
 0x191   : > { %1211 = vst.msk [vmem:[%s1678_s28 + $0x18] sm:$0xff] %vm478_vm3, %v992_v62 }
 0x192 PF: > { %s15_s19 = sadd.s32 1, %s1451_s19   ;;  %s1722_s15 = smov %s1443_s17 }
 0x193   : > { %p12_p7 = scmp.ge.s32.totalorder %s15_s19, 6   ;;  %s1723_s16 = smov %s1447_s18 }
 0x194   : > { %s1724_s17 = smov %s1727_s20  ;;  %s1725_s18 = smov %s1731_s21 }
 0x195   :  { %14 = sbr.rel (!%p12_p7) target bundleno = 3 (0x3), region = 85 }

</bundles_post_ra>
